<compile_context>
chip_gen: v5e
topology: v5e:2x2
jax: 0.10.0
libtpu: 0.0.40
codegen_flags: <defaults>
</compile_context>

<pallas_src>
import functools
import math

import jax
import jax.numpy as jnp
import numpy as np
from jax import lax
from jax.experimental import pallas as pl
from jax.experimental.pallas import tpu as pltpu


def _attention_kernel(x_ref, wqkv_ref, bqkv_ref, val_ref, w_ref,
                      qkv_sc, acc_sc, *, key_size, value_size, tk):
    K = key_size
    V = value_size
    kb = pl.program_id(1)
    num_kb = pl.num_programs(1)

    # ---- once per batch block: fused q/k/v projection as ONE flat 2-D matmul ----
    @pl.when(kb == 0)
    def _project():
        x = x_ref[...]                                       # (bb, T, C) bf16
        bb_, T_, C_ = x.shape
        x2d = x.reshape(bb_ * T_, C_)                        # (bb*T, C)
        qkv = jnp.dot(x2d, wqkv_ref[...],
                      preferred_element_type=jnp.float32)    # (bb*T, 2K+V) f32
        qkv = qkv + bqkv_ref[...]                            # bias (1, 2K+V) f32
        qkv_sc[...] = qkv.reshape(bb_, T_, -1).astype(qkv_sc.dtype)
        acc_sc[...] = jnp.zeros_like(acc_sc)

    # ---- per key block -----------------------------------------------------------
    start = pl.multiple_of(kb * tk, tk)
    q = qkv_sc[:, :, :K]                                     # (bb, T,  K) bf16, pre-scaled
    kv = qkv_sc[:, pl.ds(start, tk), :]                      # (bb, tk, 2K+V) bf16
    k_blk = kv[:, :, K:2 * K]                                # (bb, tk, K)
    v_blk = kv[:, :, 2 * K:2 * K + V]                        # (bb, tk, V)

    # scores[b, query, key] -- query weight already carries the 1/sqrt(K) scale
    s = jnp.einsum('bqd,bkd->bqk', q, k_blk,
                   preferred_element_type=jnp.float32)       # (bb, T, tk) f32

    T_ = s.shape[1]
    row = lax.broadcasted_iota(jnp.int32, (T_, tk), 0)       # query index
    col = lax.broadcasted_iota(jnp.int32, (T_, tk), 1) + start  # global key index
    s = jnp.where((col > row)[None, :, :], -jnp.inf, s)      # causal mask

    # softmax over the QUERY axis (dim=1): independent per key column, so it is
    # exact within a key block (every valid key column has >= 1 unmasked entry).
    m = jnp.max(s, axis=1, keepdims=True)                    # (bb, 1, tk)
    e = jnp.exp(s - m)
    denom = jnp.sum(e, axis=1, keepdims=True)
    w = e * pl.reciprocal(denom, approx=False)               # exact recip (tiny tensor)

    w_ref[...] = w.astype(w_ref.dtype)                       # weight_temp block

    # accumulate directly in lane-dense (bb, V, T) layout -- no finalize transpose
    acc_sc[...] += jnp.einsum('bkv,bqk->bvq', v_blk, w.astype(v_blk.dtype),
                              preferred_element_type=jnp.float32)

    @pl.when(kb == num_kb - 1)
    def _finalize():
        val_ref[...] = acc_sc[...].astype(val_ref.dtype)     # one unmasked store


def attention_block(x, wq, bq, wk, bk, wv, bv, key_size, *, block_b=8,
                    weights_dtype=jnp.float32):
    B, T, C = x.shape
    K = wq.shape[0]
    V = wv.shape[0]
    N = 2 * K + V

    inv_sqrt = 1.0 / math.sqrt(key_size)

    # Fused, pre-transposed projection weight (C, 2K+V); the attention scale is
    # folded into the query weight & bias.  Weights bf16 for the MXU; bias stays f32.
    wqkv_t = jnp.concatenate([(wq * inv_sqrt).T, wk.T, wv.T],
                             axis=1).astype(jnp.bfloat16)           # (C, N)
    bqkv = jnp.concatenate([bq * inv_sqrt, bk, bv]).reshape(1, N).astype(jnp.float32)

    # ---- generation-aware VMEM budget -------------------------------------------
    try:
        vmem_cap = int(pltpu.get_tpu_info().vmem_capacity_bytes)
    except Exception:
        vmem_cap = 64 * 1024 * 1024          # conservative fallback (v7x-sized)
    if vmem_cap <= 64 * 1024 * 1024:         # v7x: 64 MiB physical per TC
        vmem_limit = 48 * 1024 * 1024
    else:                                    # v5e / v6e: 128 MiB physical
        vmem_limit = 64 * 1024 * 1024
    fit_budget = (vmem_limit * 7) // 8       # headroom for compiler-internal temps

    w_bytes = jnp.dtype(weights_dtype).itemsize

    def _ru(a, m):
        return ((a + m - 1) // m) * m

    def _fits(bb_, tk_):
        # pipeline (double-buffered) blocks, with lane(128)/sublane padding
        x_blk = 2 * bb_ * _ru(T, 16) * _ru(C, 128) * 2
        w_in = 2 * _ru(C, 16) * _ru(N, 128) * 2
        b_in = 2 * 8 * _ru(N, 128) * 4
        val_out = 2 * bb_ * _ru(V, 8) * _ru(T, 128) * 4
        wt_out = 2 * bb_ * _ru(T, 8) * _ru(tk_, 128) * w_bytes
        # persistent scratch
        qkv_s = bb_ * _ru(T, 16) * _ru(N, 128) * 2
        acc_s = bb_ * _ru(V, 8) * _ru(T, 128) * 4
        # in-kernel f32 temporaries (projection result; s / e / w score blocks)
        proj_t = bb_ * _ru(T, 8) * _ru(N, 128) * 4
        score_t = 3 * bb_ * _ru(T, 8) * _ru(tk_, 128) * 4
        total = (x_blk + w_in + b_in + val_out + wt_out
                 + qkv_s + acc_s + proj_t + score_t)
        return total <= fit_budget

    # ---- key-axis tile candidates: lane-dense (128-multiple) divisors of T ------
    tk_cands = [d for d in (512, 384, 256, 128) if d <= T and T % d == 0]
    if T % 128 == 0 and T <= 512 and T not in tk_cands:
        tk_cands.insert(0, T)
    if not tk_cands:
        tk_cands = [T]          # no clean 128-multiple divisor: use full key axis

    # ---- batch-block candidates: divisors of B, capped so the 'parallel' grid ----
    # axis has >= 2 programs (both v7x TensorCores get work)
    bb_max = max(1, min(block_b, B // 2 if B >= 2 else B))
    bb_cands = [d for d in range(bb_max, 0, -1) if B % d == 0]

    bb, tk = 1, tk_cands[-1]
    chosen = False
    for bb_c in bb_cands:                    # shrink tk before shrinking bb
        for tk_c in tk_cands:
            if _fits(bb_c, tk_c):
                bb, tk = bb_c, tk_c
                chosen = True
                break
        if chosen:
            break

    num_kb = T // tk
    x_bf16 = x.astype(jnp.bfloat16)

    kernel = functools.partial(_attention_kernel, key_size=K, value_size=V, tk=tk)

    grid_spec = pltpu.PrefetchScalarGridSpec(
        num_scalar_prefetch=0,
        grid=(B // bb, num_kb),
        in_specs=[
            pl.BlockSpec((bb, T, C), lambda b, k: (b, 0, 0)),   # x (constant over k)
            pl.BlockSpec((C, N), lambda b, k: (0, 0)),          # fused W^T
            pl.BlockSpec((1, N), lambda b, k: (0, 0)),          # fused bias
        ],
        out_specs=[
            pl.BlockSpec((bb, V, T), lambda b, k: (b, 0, 0)),   # value_attentioned
            pl.BlockSpec((bb, T, tk), lambda b, k: (b, 0, k)),  # weight_temp block
        ],
        scratch_shapes=[
            pltpu.VMEM((bb, T, N), jnp.bfloat16),   # fused q|k|v (q pre-scaled)
            pltpu.VMEM((bb, V, T), jnp.float32),    # lane-dense (V, T) accumulator
        ],
    )

    out_shape = (
        jax.ShapeDtypeStruct((B, V, T), jnp.float32),
        jax.ShapeDtypeStruct((B, T, T), weights_dtype),
    )

    flops = 2 * B * T * C * N + 2 * B * T * T * K + 2 * B * T * T * V
    bytes_accessed = (B * T * C * 2 + C * N * 2 + N * 4
                      + B * V * T * 4 + B * T * T * w_bytes)
    cost = pl.CostEstimate(flops=flops, transcendentals=B * T * T,
                           bytes_accessed=bytes_accessed)

    return pl.pallas_call(
        kernel,
        out_shape=out_shape,
        grid_spec=grid_spec,
        compiler_params=pltpu.CompilerParams(
            dimension_semantics=("parallel", "arbitrary"),
            vmem_limit_bytes=vmem_limit),
        cost_estimate=cost,
    )(x_bf16, wqkv_t, bqkv)


def attention_block_ref(x, wq, bq, wk, bk, wv, bv, key_size):
    """Pure-JAX (f32) reference mirroring the PyTorch forward exactly."""
    T = x.shape[1]
    keys = x @ wk.T + bk
    query = x @ wq.T + bq
    values = x @ wv.T + bv
    temp = jnp.einsum('btk,bsk->bts', query, keys)
    row = jnp.arange(T)[:, None]
    col = jnp.arange(T)[None, :]
    temp = jnp.where(col > row, -jnp.inf, temp)
    weight_temp = jax.nn.softmax(temp / math.sqrt(key_size), axis=1)
    value_attentioned = jnp.einsum('bts,bsv->btv', weight_temp, values)
    return jnp.transpose(value_attentioned, (0, 2, 1)), weight_temp


if __name__ == "__main__":
    B, T, C = 2, 8, 16          # batch, sequence length, in_channels
    key_size, value_size = 8, 8

    key = jax.random.PRNGKey(0)
    ks = jax.random.split(key, 7)
    x = jax.random.normal(ks[0], (B, T, C), dtype=jnp.float32)

    # nn.Linear default init: U(-1/sqrt(fan_in), 1/sqrt(fan_in)) for weight and bias
    lim = 1.0 / math.sqrt(C)
    wq = jax.random.uniform(ks[1], (key_size, C), jnp.float32, -lim, lim)
    bq = jax.random.uniform(ks[2], (key_size,), jnp.float32, -lim, lim)
    wk = jax.random.uniform(ks[3], (key_size, C), jnp.float32, -lim, lim)
    bk = jax.random.uniform(ks[4], (key_size,), jnp.float32, -lim, lim)
    wv = jax.random.uniform(ks[5], (value_size, C), jnp.float32, -lim, lim)
    bv = jax.random.uniform(ks[6], (value_size,), jnp.float32, -lim, lim)

    val, wt = attention_block(x, wq, bq, wk, bk, wv, bv, key_size)
    jax.block_until_ready((val, wt))

    val_exp, wt_exp = attention_block_ref(x, wq, bq, wk, bk, wv, bv, key_size)
    # bf16 MXU inputs (q/k/v, attention weights into the value matmul) => relaxed tol
    assert np.allclose(np.asarray(val), np.asarray(val_exp), atol=2e-2, rtol=2e-2)
    assert np.allclose(np.asarray(wt), np.asarray(wt_exp), atol=2e-2, rtol=2e-2)

    print("KERNEL_OK")
</pallas_src>

<mosaic_0001>
module attributes {stable_mosaic.version = 11 : i64} {
  func.func @_attention_kernel(%arg0: i32, %arg1: i32, %arg2: memref<1x8x16xbf16, #tpu.memory_space<vmem>>, %arg3: memref<16x24xbf16, #tpu.memory_space<vmem>>, %arg4: memref<1x24xf32, #tpu.memory_space<vmem>>, %arg5: memref<1x8x8xf32, #tpu.memory_space<vmem>>, %arg6: memref<1x8x8xf32, #tpu.memory_space<vmem>>, %arg7: memref<1x8x24xbf16, #tpu.memory_space<vmem>>, %arg8: memref<1x8x8xf32, #tpu.memory_space<vmem>>) attributes {dimension_semantics = [#tpu.dimension_semantics<parallel>, #tpu.dimension_semantics<arbitrary>], iteration_bounds = array<i64: 2, 1>, scalar_prefetch = 0 : i64, scratch_operands = 2 : i64, tpu.core_type = #tpu.core_type<tc>, window_params = [{transform_indices = @transform_0, window_bounds = array<i64: 1, 8, 16>}, {pipeline_mode = #tpu.pipeline_mode<synchronous>, transform_indices = @transform_1, window_bounds = array<i64: 16, 24>}, {pipeline_mode = #tpu.pipeline_mode<synchronous>, transform_indices = @transform_2, window_bounds = array<i64: 1, 24>}, {transform_indices = @transform_3, window_bounds = array<i64: 1, 8, 8>}, {transform_indices = @transform_4, window_bounds = array<i64: 1, 8, 8>}]} {
    %c0_i32 = arith.constant 0 : i32
    %0 = arith.cmpi eq, %arg1, %c0_i32 : i32
    %1 = arith.extui %0 : i1 to i32
    %c0_i32_0 = arith.constant 0 : i32
    %2 = arith.cmpi ne, %1, %c0_i32_0 : i32
    scf.if %2 {
      %c0_20 = arith.constant 0 : index
      %c0_21 = arith.constant 0 : index
      %c0_22 = arith.constant 0 : index
      %38 = vector.load %arg2[%c0_20, %c0_21, %c0_22] : memref<1x8x16xbf16, #tpu.memory_space<vmem>>, vector<1x8x16xbf16>
      %39 = vector.shape_cast %38 : vector<1x8x16xbf16> to vector<8x16xbf16>
      %c0_23 = arith.constant 0 : index
      %c0_24 = arith.constant 0 : index
      %40 = vector.load %arg3[%c0_23, %c0_24] : memref<16x24xbf16, #tpu.memory_space<vmem>>, vector<16x24xbf16>
      %cst_25 = arith.constant dense<0.000000e+00> : vector<8x24xf32>
      %41 = tpu.matmul %39, %40, %cst_25 {dimension_numbers = #tpu.dot_dimension_numbers<[1], [0], [0], [1], [0, 0, 1, 1], [], []>} : vector<8x16xbf16>, vector<16x24xbf16>, vector<8x24xf32> -> vector<8x24xf32>
      %c0_26 = arith.constant 0 : index
      %c0_27 = arith.constant 0 : index
      %42 = vector.load %arg4[%c0_26, %c0_27] : memref<1x24xf32, #tpu.memory_space<vmem>>, vector<1x24xf32>
      %43 = vector.broadcast %42 : vector<1x24xf32> to vector<8x24xf32>
      %44 = arith.addf %41, %43 : vector<8x24xf32>
      %45 = vector.shape_cast %44 : vector<8x24xf32> to vector<1x8x24xf32>
      %46 = arith.truncf %45 : vector<1x8x24xf32> to vector<1x8x24xbf16>
      %c0_28 = arith.constant 0 : index
      %c0_29 = arith.constant 0 : index
      %c0_30 = arith.constant 0 : index
      %47 = vector.load %arg7[%c0_28, %c0_29, %c0_30] : memref<1x8x24xbf16, #tpu.memory_space<vmem>>, vector<1x8x24xbf16>
      tpu.vector_store %arg7[%c0_28, %c0_29, %c0_30], %46 {strides = array<i32>} : memref<1x8x24xbf16, #tpu.memory_space<vmem>>, vector<1x8x24xbf16>,
      %cst_31 = arith.constant 0.000000e+00 : f32
      %48 = vector.broadcast %cst_31 : f32 to vector<1x8x8xf32>
      %c0_32 = arith.constant 0 : index
      %c0_33 = arith.constant 0 : index
      %c0_34 = arith.constant 0 : index
      %49 = vector.load %arg8[%c0_32, %c0_33, %c0_34] : memref<1x8x8xf32, #tpu.memory_space<vmem>>, vector<1x8x8xf32>
      tpu.vector_store %arg8[%c0_32, %c0_33, %c0_34], %48 {strides = array<i32>} : memref<1x8x8xf32, #tpu.memory_space<vmem>>, vector<1x8x8xf32>,
    } else {
    }
    %c8_i32 = arith.constant 8 : i32
    %3 = arith.muli %arg1, %c8_i32 : i32
    %4 = tpu.assume_multiple %3, 8 : i32
    %c0 = arith.constant 0 : index
    %c0_1 = arith.constant 0 : index
    %c0_2 = arith.constant 0 : index
    %5 = vector.load %arg7[%c0, %c0_1, %c0_2] : memref<1x8x24xbf16, #tpu.memory_space<vmem>>, vector<1x8x8xbf16>
    %c0_3 = arith.constant 0 : index
    %6 = arith.index_cast %4 : i32 to index
    %c0_4 = arith.constant 0 : index
    %7 = vector.load %arg7[%c0_3, %6, %c0_4] : memref<1x8x24xbf16, #tpu.memory_space<vmem>>, vector<1x8x24xbf16>
    %8 = vector.extract_strided_slice %7 {offsets = [0, 0, 8], sizes = [1, 8, 8], strides = [1, 1, 1]} : vector<1x8x24xbf16> to vector<1x8x8xbf16>
    %9 = vector.extract_strided_slice %7 {offsets = [0, 0, 16], sizes = [1, 8, 8], strides = [1, 1, 1]} : vector<1x8x24xbf16> to vector<1x8x8xbf16>
    "tpu.trace_start"() <{level = 10 : i32, message = "bqd,bkd->bqk"}> : () -> ()
    %cst = arith.constant dense<0.000000e+00> : vector<1x8x8xf32>
    %10 = tpu.matmul %5, %8, %cst {dimension_numbers = #tpu.dot_dimension_numbers<[2], [2], [1], [1], [0, 0, 0, 1, 1, 1], [0], [0]>} : vector<1x8x8xbf16>, vector<1x8x8xbf16>, vector<1x8x8xf32> -> vector<1x8x8xf32>
    "tpu.trace_stop"() : () -> ()
    %11 = tpu.iota {dimensions = array<i32: 0>} : vector<8x8xi32>
    %12 = tpu.iota {dimensions = array<i32: 1>} : vector<8x8xi32>
    %13 = vector.broadcast %4 : i32 to vector<8x8xi32>
    %14 = arith.addi %12, %13 : vector<8x8xi32>
    %15 = arith.cmpi sgt, %14, %11 : vector<8x8xi32>
    %16 = vector.shape_cast %15 : vector<8x8xi1> to vector<1x8x8xi1>
    %cst_5 = arith.constant 0xFF800000 : f32
    %17 = vector.broadcast %cst_5 : f32 to vector<1x8x8xf32>
    %18 = arith.select %16, %17, %10 : vector<1x8x8xi1>, vector<1x8x8xf32>
    %cst_6 = arith.constant dense<0xFF800000> : vector<1x8xf32>
    %19 = vector.multi_reduction <maximumf>, %18, %cst_6 [1] : vector<1x8x8xf32> to vector<1x8xf32>
    %20 = vector.shape_cast %19 : vector<1x8xf32> to vector<1x1x8xf32>
    %21 = vector.broadcast %20 : vector<1x1x8xf32> to vector<1x8x8xf32>
    %22 = arith.subf %18, %21 : vector<1x8x8xf32>
    %23 = math.exp %22 : vector<1x8x8xf32>
    %cst_7 = arith.constant dense<0.000000e+00> : vector<1x8xf32>
    %24 = vector.multi_reduction <add>, %23, %cst_7 [1] : vector<1x8x8xf32> to vector<1x8xf32>
    %25 = vector.shape_cast %24 : vector<1x8xf32> to vector<1x1x8xf32>
    %26 = tpu.reciprocal %25 : vector<1x1x8xf32> -> vector<1x1x8xf32>
    %27 = vector.broadcast %26 : vector<1x1x8xf32> to vector<1x8x8xf32>
    %28 = arith.mulf %23, %27 : vector<1x8x8xf32>
    %c0_8 = arith.constant 0 : index
    %c0_9 = arith.constant 0 : index
    %c0_10 = arith.constant 0 : index
    %29 = vector.load %arg6[%c0_8, %c0_9, %c0_10] : memref<1x8x8xf32, #tpu.memory_space<vmem>>, vector<1x8x8xf32>
    tpu.vector_store %arg6[%c0_8, %c0_9, %c0_10], %28 {strides = array<i32>} : memref<1x8x8xf32, #tpu.memory_space<vmem>>, vector<1x8x8xf32>,
    %c0_11 = arith.constant 0 : index
    %c0_12 = arith.constant 0 : index
    %c0_13 = arith.constant 0 : index
    %30 = vector.load %arg8[%c0_11, %c0_12, %c0_13] : memref<1x8x8xf32, #tpu.memory_space<vmem>>, vector<1x8x8xf32>
    %31 = arith.truncf %28 : vector<1x8x8xf32> to vector<1x8x8xbf16>
    "tpu.trace_start"() <{level = 10 : i32, message = "bkv,bqk->bvq"}> : () -> ()
    %cst_14 = arith.constant dense<0.000000e+00> : vector<1x8x8xf32>
    %32 = tpu.matmul %9, %31, %cst_14 {dimension_numbers = #tpu.dot_dimension_numbers<[1], [2], [2], [1], [0, 0, 0, 2, 1, 1], [0], [0]>} : vector<1x8x8xbf16>, vector<1x8x8xbf16>, vector<1x8x8xf32> -> vector<1x8x8xf32>
    "tpu.trace_stop"() : () -> ()
    %33 = arith.addf %30, %32 : vector<1x8x8xf32>
    %c0_15 = arith.constant 0 : index
    %c0_16 = arith.constant 0 : index
    %c0_17 = arith.constant 0 : index
    %34 = vector.load %arg8[%c0_15, %c0_16, %c0_17] : memref<1x8x8xf32, #tpu.memory_space<vmem>>, vector<1x8x8xf32>
    tpu.vector_store %arg8[%c0_15, %c0_16, %c0_17], %33 {strides = array<i32>} : memref<1x8x8xf32, #tpu.memory_space<vmem>>, vector<1x8x8xf32>,
    %c0_i32_18 = arith.constant 0 : i32
    %35 = arith.cmpi eq, %arg1, %c0_i32_18 : i32
    %36 = arith.extui %35 : i1 to i32
    %c0_i32_19 = arith.constant 0 : i32
    %37 = arith.cmpi ne, %36, %c0_i32_19 : i32
    scf.if %37 {
      %c0_20 = arith.constant 0 : index
      %c0_21 = arith.constant 0 : index
      %c0_22 = arith.constant 0 : index
      %38 = vector.load %arg8[%c0_20, %c0_21, %c0_22] : memref<1x8x8xf32, #tpu.memory_space<vmem>>, vector<1x8x8xf32>
      %c0_23 = arith.constant 0 : index
      %c0_24 = arith.constant 0 : index
      %c0_25 = arith.constant 0 : index
      %39 = vector.load %arg5[%c0_23, %c0_24, %c0_25] : memref<1x8x8xf32, #tpu.memory_space<vmem>>, vector<1x8x8xf32>
      tpu.vector_store %arg5[%c0_23, %c0_24, %c0_25], %38 {strides = array<i32>} : memref<1x8x8xf32, #tpu.memory_space<vmem>>, vector<1x8x8xf32>,
    } else {
    }
    return
  }
  func.func @transform_0(%arg0: i32, %arg1: i32) -> (i32, i32, i32) {
    %c0_i32 = arith.constant 0 : i32
    %c0_i32_0 = arith.constant 0 : i32
    %c0_i32_1 = arith.constant 0 : i32
    return %arg0, %c0_i32, %c0_i32_0 : i32, i32, i32
  }
  func.func @transform_1(%arg0: i32, %arg1: i32) -> (i32, i32) {
    %c0_i32 = arith.constant 0 : i32
    %c0_i32_0 = arith.constant 0 : i32
    %c0_i32_1 = arith.constant 0 : i32
    return %c0_i32, %c0_i32_0 : i32, i32
  }
  func.func @transform_2(%arg0: i32, %arg1: i32) -> (i32, i32) {
    %c0_i32 = arith.constant 0 : i32
    %c0_i32_0 = arith.constant 0 : i32
    %c0_i32_1 = arith.constant 0 : i32
    return %c0_i32, %c0_i32_0 : i32, i32
  }
  func.func @transform_3(%arg0: i32, %arg1: i32) -> (i32, i32, i32) {
    %c0_i32 = arith.constant 0 : i32
    %c0_i32_0 = arith.constant 0 : i32
    %c0_i32_1 = arith.constant 0 : i32
    return %arg0, %c0_i32, %c0_i32_0 : i32, i32, i32
  }
  func.func @transform_4(%arg0: i32, %arg1: i32) -> (i32, i32, i32) {
    %c0_i32 = arith.constant 0 : i32
    %c0_i32_0 = arith.constant 0 : i32
    return %arg0, %c0_i32, %arg1 : i32, i32, i32
  }
}

</mosaic_0001>

<bundles_post_ra>
// kernel: tpu_custom_call.1
= control target key start
LH: loop header
LB: loop body
LE: loop exit
PB: predicated region body
PF: predicated region fallthrough
CT: control target
= control target key end

     0   :  { %10 = vsyncpa [#allocation5], 0  ;;  %s1078_s0 = inlined_call_operand.hbm [shape: bf16[2,8,16], index: 0, kind: input, shape index: {}]   ;;  %s1079_s1 = inlined_call_operand.hbm [shape: bf16[16,24], index: 1, kind: input, shape index: {}]   ;;  %s1080_s2 = inlined_call_operand.vmem [shape: f32[1,24], index: 2, kind: input, shape index: {}]   ;;  %s1081_s3 = inlined_call_operand.hbm [shape: f32[2,8,8], index: 3, kind: output, shape index: {0}]   ;;  %s1082_s4 = inlined_call_operand.hbm [shape: f32[2,8,8], index: 4, kind: output, shape index: {1}]  }
   0x1   :  { %12 = vsyncpa [#allocation5 + $0x1], 0 }
   0x2   :  { %13 = vsyncpa [#allocation8], 0 }
   0x3   :  { %14 = vsyncpa [#allocation6], 0 }
   0x4   :  { %16 = vsyncpa [#allocation6 + $0x1], 0 }
   0x5   :  { %17 = vsyncpa [#allocation11], 0 }
   0x6   :  { %19 = vsyncpa [#allocation11 + $0x1], 0  ;;  %s903_s15 = smov 0   ;;  %s905_s16 = smov 0  }
   0x7   :  { %s907_s17 = smov 0   ;;  %s909_s18 = smov 0  }
   0x8   :  { %s911_s19 = smov 0   ;;  %s913_s20 = smov 0  }
   0x9 LB: > { %s577_s21 = sadd.s32 4294967295, %s870_s20   ;;  %p579_p0 = scmp.ge.s32.totalorder %s870_s20, 1  ;;  %s870_s20 = sphi %s913_s20, %s25_s20   ;;  %s866_s19 = sphi %s911_s19, %s1093_s19   ;;  %s862_s18 = sphi %s909_s18, %s1092_s18   ;;  %s858_s17 = sphi %s907_s17, %s1091_s17   ;;  %s854_s16 = sphi %s905_s16, %s1090_s16   ;;  %s850_s15 = sphi %s903_s15, %s1089_s15  }
   0xa   : > { %p935_p1 = scmp.eq.s32.totalorder %s577_s21, 0  ;;  %p164_p2 = scmp.lt.s32.totalorder %s870_s20, 3 }
   0xb   : > { %s175_s25 = sshll.u32 %s1079_s1, 4  ;;  %s872_s27 = smov [#allocation7]   ;;  %s176_s25 = int_to_ptr.hbm [resolvable:$true] %s175_s25 }
   0xc   : > { %p943_p3 = pnand %p579_p0, %p164_p2  ;;  %s177_s28 = sshll.u32 %s872_s27, 4  ;;  %s178_s28 = int_to_ptr.vmem [resolvable:$true] %s177_s28 }
   0xd   : > { %p581_p6 = scmp.ge.s32.totalorder %s870_s20, 2  ;;  %s873_s29 = smov 64  }
   0xe   : > { %p613_p4 = pneg %p943_p3  ;;  %s874_s30 = smov 4  }
   0xf   : > { %s578_s5 = sadd.s32 4294967294, %s870_s20   ;;  %s37_s6 = sadd.s32 1, %s866_s19 }
  0x10   : > { %p614_p5 = pnand %p613_p4, %p935_p1  ;;  %s44_s7 = sadd.s32 1, %s858_s17 }
  0x11   : > { %p39_p7 = scmp.ge.s32.totalorder %s37_s6, 2  ;;  %p51_p8 = scmp.ne.s32.totalorder %s858_s17, %s854_s16 }
  0x12   : > { %616 = dma.hbm_to_vmem [thread:$0]  (!%p614_p5), %s176_s25, 128, %s178_s28, [#allocation8], %s873_s29, %s873_s29, %s874_s30  }
  0x13   : > { %p52_p9 = scmp.eq.s32.totalorder %s870_s20, 0  ;;  %p57_p10 = scmp.ne.s32.totalorder %s854_s16, %s850_s15 }
  0x14   : > { %s1095_s6 = smov (%p39_p7, %s37_s6), 0  ;;  %p123_p13 = scmp.eq.s32.totalorder %s577_s21, 1 }
  0x15   : > { %p962_p11 = por %p52_p9, %p51_p8  ;;  %p968_p12 = por %p935_p1, %p57_p10 }
  0x16   : > { %s41_s10 = ssub.s32 %s866_s19, %s1095_s6  ;;  %p129_p2 = scmp.eq.s32.totalorder %s578_s5, 1 }
  0x17   : > { %p42_p0 = scmp.eq.s32.totalorder %s41_s10, 0  ;;  %p974_p4 = por %p123_p13, %p51_p8 }
  0x18   : > { %p629_p5 = scmp.lt.s32.totalorder %s870_s20, 2  ;;  %p982_p7 = por %p129_p2, %p57_p10 }
  0x19   : > { %s980_s12 = scalar_select %p42_p0, %s858_s17, %s44_s7  }
  0x1a   : > { %s194_s14 = sand.u32 1, %s858_s17   ;;  %s583_s24 = sshll.u32 %s866_s19, 2 }
  0x1b   : > { %s582_s23 = sshll.u32 %s194_s14, 2  ;;  %s202_s21 = scalar_lea.hbm %s1078_s0, %s583_s24 }
  0x1c   : > { %s198_s28 = scalar_lea.vmem [#allocation4], %s582_s23  ;;  %s204_s30 = sshll.u32 %s202_s21, 4  ;;  %s205_s30 = int_to_ptr.hbm [resolvable:$true] %s204_s30 }
  0x1d   : > { %s206_s29 = sshll.u32 %s198_s28, 4  ;;  %p618_p8 = pnand %p629_p5, %p962_p11  ;;  %s207_s29 = int_to_ptr.vmem [resolvable:$true] %s206_s29 }
  0x1e   : > { %s195_s5 = scalar_lea.sflag [#allocation5], %s194_s14  ;;  %215 = sbr.rel (%p943_p3) target bundleno = 645 (0x285), region = 32 }
  0x1f   : > { %620 = dma.hbm_to_vmem [thread:$0]  (!%p618_p8), %s205_s30, 64, %s207_s29, %s195_s5  }
  0x20   : > { %s996_s7 = sand.u32 (!%p943_p3), 1, %s854_s16  }
  0x21   : > { %s585_s10 = sshll.u32 (!%p943_p3), %s996_s7, 2  ;;  %s218_s24 = scalar_lea.sflag (!%p943_p3), [#allocation5], %s996_s7 }
  0x22   : > { %s221_s23 = scalar_lea.vmem (!%p943_p3), [#allocation4], %s585_s10 }
  0x23   : > { %833 = dma.done.wait (%p968_p12), %s218_s24, 64  }
  0x24   : > { %835 = vsyncadd (%p968_p12), %s218_s24, 4294967232 }
  0x25   : > { %837 = dma.done.wait (%p935_p1), [#allocation8], 128  }
  0x26   : > { %839 = vsyncadd (%p935_p1), [#allocation8], 4294967168  ;;  %v602_v0 = vld [vmem:[#allocation7] sm:$0xff]  ;;  %v262_v1 = vld [vmem:[%s221_s23] sm:$0xf]  ;;  %vm275_vm0 = vcmask 130048   ;;  %v329_v14 = vlaneseq }
  0x27   : > { %286 = vmatpush.bf16.msra.mxu0 %v602_v0  ;;  %v687_v2 = vld [vmem:[%s1080_s2] ss:$0 sm:$0xff]  ;;  %vm293_vm1 = vcmask 191488   ;;  %s875_s22 = smov 120   ;;  %s876_s9 = smov 112   ;;  %vm295_vm2 = vcmask 64512  }
  0x28   : > { %v330_v15 = vshrl.u32 %v329_v14, 7  ;;  %v332_v16 = vand.u32 127, %v329_v14  ;;  %v877_v37 = vmov 0.0   ;;  %s587_s14 = sshll.u32 %s996_s7, 3  ;;  %s598_s27 = sshll.u32 %s862_s18, 3 }
  0x29   : > { %296 = vst.msk [vmem:[#allocation3] sm:$0xff] %vm295_vm2, %v877_v37  ;;  %s256_s25 = scalar_lea.vmem [#allocation10], %s587_s14  ;;  %s448_s29 = scalar_lea.hbm %s1082_s4, %s598_s27 }
  0x2a   : > { %593 = vmatmul.msk.bf16.vlgmr.msra.gmra.mxu0 %vm275_vm0, %v262_v1  ;;  %vm335_vm3 = vcmp.gt.s32.totalorder %v332_v16, %v330_v15  ;;  %s450_s30 = sshll.u32 %s256_s25, 4  ;;  %s452_s5 = sshll.u32 %s448_s29, 4  ;;  %s451_s30 = int_to_ptr.vmem [resolvable:$true] %s450_s30  ;;  %s453_s5 = int_to_ptr.hbm [resolvable:$true] %s452_s5 }
  0x2b   : > { %s423_s10 = scalar_lea.sflag [#allocation11], %s996_s7  ;;  %s766_s24 = sshra.s32 %s453_s5, 4  ;;  %s767_s24 = int_to_ptr.hbm [resolvable:$true] %s766_s24 }
  0x2c   : > { %s768_s23 = scalar_lea.hbm %s767_s24, 8  ;;  %s772_s18 = scalar_lea.hbm %s1082_s4, 16 }
  0x2d   : > { %p769_p1 = scmp.ne.s32.totalorder %s767_s24, %s768_s23  ;;  %p773_p10 = scmp.lt.s32.totalorder %s767_s24, %s1082_s4 }
  0x2e   : > { %p774_p11 = scmp.lt.s32.totalorder %s772_s18, %s768_s23 }
  0x2f   : > { %p770_p3 = pnand %p769_p1, %p974_p4 }
  0x30   : > { %p775_p12 = por %p774_p11, %p773_p10 }
  0x31   : > { %p771_p9 = pneg %p770_p3 }
  0x33   : > { %p776_p13 = pnand %p775_p12, %p771_p9 }
  0xa7   : > { %v288_v3 = vpop.f32.mrf.mxu0 }
  0xa8   : > { %v289_v4 = vadd.f32 %v687_v2, %v288_v3 }
  0xaa   : > { %v292_v5 = vpack.c.bf16 %v289_v4, %v289_v4 }
  0xac   : > { %294 = vst.msk [vmem:[#allocation2] sm:$0xf] %vm293_vm1, %v292_v5 }
  0xaf   : > { %v290_v6 = vpop.f32.mrf.mxu0 }
  0xb3   : > { %v303_v7 = vld [vmem:[#allocation2] sm:$0xf] }
  0xb4   : > { %v305_v8 = vunpack.c.l.b16 %v303_v7  ;;  %v298_v13 = vld [vmem:[#allocation2] sm:$0xf] }
  0xb6   : > { %v306_v9 = vpack.c.b16 %v305_v8, %v305_v8 }
  0xb8   : > { %307 = vrot.lane.b32.xlu0 %v306_v9, %s875_s22 }
  0xc0   : > { %372 = vrot.lane.b32.xlu0 %v306_v9, %s876_s9 }
 0x12a   : > { %v308_v10 = vpop.permute.xlu0 %307 }
 0x12b   : > { %v314_v11 = vsel %vm295_vm2, %v308_v10, 0 }
 0x12c   : > { %323 = vmatpush.bf16.xpose.msra.mxu1 %v314_v11 }
 0x132   : > { %v373_v12 = vpop.permute.xlu0 %372 }
 0x133   : > { %375 = vxpose.xlu1.c.b16.start.end [1/1] (short) (narrow) %v373_v12, 16  ;;  %594 = vmatmul.msk.bf16.vlgmr.msra.gmra.mxu1 %vm295_vm2, %v298_v13 }
 0x1b0   : > { %v325_v17 = vpop.f32.mrf.mxu1 }
 0x1b1   : > { %v336_v18 = vsel %vm335_vm3, -inf, %v325_v17 }
 0x1b2   : > { %v337_v19 = vsel %vm295_vm2, %v336_v18, -inf }
 0x1b3   : > { %v338_v20 = vrot.slane %v337_v19, 4 }
 0x1b5   : > { %v339_v21 = vmax.f32 %v337_v19, %v338_v20 }
 0x1b7   : > { %v340_v22 = vrot.slane %v339_v21, 2 }
 0x1b8   : > { %v327_v23 = vpop.f32.mrf.mxu1 }
 0x1b9   : > { %v341_v24 = vmax.f32 %v339_v21, %v340_v22 }
 0x1bb   : > { %v342_v25 = vrot.slane %v341_v24, 1 }
 0x1bd   : > { %v343_v26 = vmax.f32 %v341_v24, %v342_v25 }
 0x1bf   : > { %v344_v27 = vsub.f32 %v336_v18, %v343_v26 }
 0x1c1   : > { %v345_v28 = vmul.f32 1.442695, %v344_v27 }
 0x1c3   : > { %688 = vpow2.f32 %v345_v28 }
 0x1c9   : > { %v689_v29 = vpop.eup %688 }
 0x1ca   : > { %v347_v30 = vsel %vm295_vm2, %v689_v29, 0.0 }
 0x1cb   : > { %v348_v31 = vrot.slane %v347_v30, 4 }
 0x1cd   : > { %v349_v32 = vadd.f32 %v348_v31, %v347_v30 }
 0x1cf   : > { %v350_v33 = vrot.slane %v349_v32, 2 }
 0x1d1   : > { %v351_v34 = vadd.f32 %v350_v33, %v349_v32 }
 0x1d3   : > { %v352_v35 = vrot.slane %v351_v34, 1 }
 0x1d5   : > { %v353_v36 = vadd.f32 %v352_v35, %v351_v34 }
 0x1d7   : > { %690 = vrcp.f32 %v353_v36  ;;  %v365_v41 = vand.u32 2147483648, %v353_v36  ;;  %v363_v43 = vand.u32 2147483647, %v353_v36  ;;  %vm359_vm5 = vweird.f32 %v353_v36 }
 0x1d9   : > { %v366_v45 = vor.u32 1.1754944e-38, %v365_v41  ;;  %vm364_vm7 = vcmp.eq.f32.partialorder %v363_v43, 8.507059e+37 }
 0x1dd   : > { %v691_v38 = vpop.eup %690 }
 0x1de   : > { %v355_v39 = vmul.f32 %v691_v38, %v353_v36  ;;  %vm360_vm4 = vweird.f32 %v691_v38 }
 0x1df   : > { %vm361_vm6 = vmor %vm359_vm5, %vm360_vm4  ;;  %v383_v51 = vpop.trf.xlu1 }
 0x1e0   : > { %v356_v40 = vsub.f32 1.0, %v355_v39 }
 0x1e2   : > { %v357_v42 = vmul.f32 %v691_v38, %v356_v40 }
 0x1e4   : > { %v358_v44 = vadd.f32 %v691_v38, %v357_v42 }
 0x1e6   : > { %v362_v46 = vsel %vm361_vm6, %v691_v38, %v358_v44 }
 0x1e7   : > { %v367_v47 = vsel %vm364_vm7, %v366_v45, %v362_v46 }
 0x1e8   : > { %v368_v48 = vmul.f32 %v689_v29, %v367_v47 }
 0x1ea   : > { %v371_v49 = vpack.c.bf16 %v368_v48, %v368_v48  ;;  %369 = vst.msk [vmem:[%s256_s25] sm:$0xff] %vm295_vm2, %v368_v48 }
 0x1ec   : > { %v395_v50 = vsel %vm295_vm2, %v371_v49, 0 }
 0x1ed   : > { %404 = vmatpush.bf16.xpose.msra.mxu2 %v395_v50 }
 0x1f4   : > { %595 = vmatmul.msk.bf16.vlgmr.msra.gmra.mxu2 %vm295_vm2, %v383_v51 }
 0x1f5   : > { %779 = shalt.err (!%p776_p13)
}
 0x1f6   : > { %610 = dma.vmem_to_hbm [thread:$0]  (%p974_p4), %s451_s30, 128, %s453_s5, %s423_s10   ;;  %v370_v52 = vld [vmem:[#allocation3] sm:$0xff] }
 0x1f7   : > { %s433_s28 = scalar_lea.hbm %s1081_s3, %s598_s27  ;;  %s249_s29 = scalar_lea.vmem [#allocation9], %s587_s14 }
 0x1f8   : > { %s435_s24 = sshll.u32 %s249_s29, 4  ;;  %s437_s23 = sshll.u32 %s433_s28, 4  ;;  %s436_s24 = int_to_ptr.vmem [resolvable:$true] %s435_s24  ;;  %s438_s23 = int_to_ptr.hbm [resolvable:$true] %s437_s23 }
 0x1f9   : > { %s418_s30 = scalar_lea.sflag [#allocation6], %s996_s7  ;;  %s794_s5 = sshra.s32 %s438_s23, 4  ;;  %s795_s5 = int_to_ptr.hbm [resolvable:$true] %s794_s5 }
 0x1fa   : > { %s796_s10 = scalar_lea.hbm %s795_s5, 8  ;;  %s800_s14 = scalar_lea.hbm %s1081_s3, 16 }
 0x1fb   : > { %p797_p0 = scmp.ne.s32.totalorder %s795_s5, %s796_s10  ;;  %p801_p8 = scmp.lt.s32.totalorder %s795_s5, %s1081_s3 }
 0x1fc   : > { %p802_p1 = scmp.lt.s32.totalorder %s800_s14, %s796_s10 }
 0x1fd   : > { %p798_p2 = pnand %p797_p0, %p974_p4 }
 0x1fe   : > { %p803_p3 = por %p802_p1, %p801_p8 }
 0x1ff   : > { %p799_p5 = pneg %p798_p2 }
 0x201   : > { %p804_p9 = pnand %p803_p3, %p799_p5 }
 0x277   : > { %v406_v53 = vpop.f32.mrf.mxu2 }
 0x278   : > { %v410_v54 = vadd.f32 %v406_v53, %v370_v52 }
 0x27a   : > { %411 = vst.msk [vmem:[#allocation3] sm:$0xff] %vm295_vm2, %v410_v54 }
 0x27f   : > { %v408_v55 = vpop.f32.mrf.mxu2 }
 0x281   : > { %v415_v56 = vld [vmem:[#allocation3] sm:$0xff] }
 0x282   : > { %416 = vst.msk [vmem:[%s249_s29] sm:$0xff] %vm295_vm2, %v415_v56 }
 0x283   : > { %807 = shalt.err (!%p804_p9)
}
 0x284   : > { %609 = dma.vmem_to_hbm [thread:$0]  (%p974_p4), %s436_s24, 128, %s438_s23, %s418_s30  }
 0x285 PF: > { %s464_s7 = sand.u32 1, %s850_s15   ;;  %p622_p10 = pnand %p581_p6, %p982_p7 }
 0x286   : > { %s465_s22 = scalar_lea.sflag [#allocation6], %s464_s7 }
 0x287   : > { %p623_p11 = pneg %p622_p10 }
 0x289   : > { %841 = dma.done.wait (%p623_p11), %s465_s22, 128  }
 0x28a   : > { %843 = vsyncadd (%p623_p11), %s465_s22, 4294967168  ;;  %s475_s9 = scalar_lea.sflag [#allocation11], %s464_s7 }
 0x28b   : > { %845 = dma.done.wait (%p623_p11), %s475_s9, 128  }
 0x28c   : > { %847 = vsyncadd (%p623_p11), %s475_s9, 4294967168  ;;  %s25_s20 = sadd.s32 1, %s870_s20   ;;  %s1089_s15 = smov %s854_s16 }
 0x28d   : > { %p22_p12 = scmp.ge.s32.totalorder %s25_s20, 4   ;;  %s1090_s16 = smov %s858_s17 }
 0x28e   : > { %s1091_s17 = smov %s980_s12  ;;  %s1092_s18 = smov %s866_s19 }
 0x28f   : > { %s1093_s19 = smov %s1095_s6  ;;  %24 = sbr.rel (!%p22_p12) target bundleno = 9 (0x9), region = 107 }
 0x294   :  { %481 = vsyncpa [#allocation5], 1 }
 0x295   :  { %483 = vsyncpa [#allocation5 + $0x1], 1 }
 0x296   :  { %484 = vsyncpa [#allocation8], 1 }
 0x297   :  { %485 = vsyncpa [#allocation6], 1 }
 0x298   :  { %487 = vsyncpa [#allocation6 + $0x1], 1 }
 0x299   :  { %488 = vsyncpa [#allocation11], 1 }
 0x29a   :  { %490 = vsyncpa [#allocation11 + $0x1], 1 }

</bundles_post_ra>
